<compile_context>
chip_gen: v7x
topology: tpu7x:2x2x1
jax: 0.10.0
libtpu: 0.0.40
codegen_flags: <defaults>
</compile_context>

<pallas_src>
import functools

import jax
import jax.numpy as jnp
from jax import lax
from jax.experimental import pallas as pl
from jax.experimental.pallas import tpu as pltpu


def _net_kernel(x_ref, w1_ref, b1_ref, w2_ref, b2_ref, out_ref):
    # fc1 + sigmoid, computed transposed without materializing x^T:
    #   h^T = sigmoid(W1 @ x^T + b1)
    #   w1_ref: (n_hid, n_in), x_ref: (tm, n_in)  --contract dim 1 of both-->
    #   h: (n_hid, tm)   (batch on lanes)
    h = lax.dot_general(
        w1_ref[...], x_ref[...],
        dimension_numbers=(((1,), (1,)), ((), ())),
        preferred_element_type=jnp.float32)
    h = jax.nn.sigmoid(h + b1_ref[...])          # b1 is (n_hid, 1), lane-broadcast

    # fc2: logits^T = W2 @ h^T + b2  -> (n_out, tm)
    logits = jnp.dot(w2_ref[...], h, preferred_element_type=jnp.float32)
    logits = logits + b2_ref[...]                # b2 is (n_out, 1)

    # argmax over classes (sublane axis 0). softmax omitted: it is a
    # monotone per-column transform, so argmax(softmax(z)) == argmax(z).
    n_out = logits.shape[0]
    cls = lax.broadcasted_iota(jnp.int32, logits.shape, 0)
    m = jnp.max(logits, axis=0, keepdims=True)                        # (1, tm)
    idx = jnp.min(jnp.where(logits == m, cls, jnp.int32(n_out)),
                  axis=0, keepdims=True)                              # (1, tm)
    out_ref[...] = idx                                                # lane-dense store


@functools.partial(jax.jit, static_argnames=("tm_max",))
def net_forward(x, w1, b1, w2, b2, *, tm_max=16384):
    """Forward pass of `Net`.

    x : (B, n_in) f32
    w1: (n_hid, n_in)  f32   (PyTorch nn.Linear layout)
    b1: (n_hid,)       f32
    w2: (n_out, n_hid) f32
    b2: (n_out,)       f32
    returns: (B,) int32 class indices
    """
    B, n_in = x.shape
    n_hid = w1.shape[0]
    n_out = w2.shape[0]

    # Batch tile (lane axis of intermediates / output).
    if B <= 256:
        # Single small tile equal to the full batch (block == full dim is legal
        # regardless of (8,128) divisibility).
        tm = B
    else:
        # Lane-aligned tile; aim for >=2 tiles so both v7x TensorCores get work,
        # capped to keep VMEM well under the v5e 16 MiB scoped default.
        tm = min(tm_max, 128 * pl.cdiv(B, 2 * 128))

    grid = (pl.cdiv(B, tm),)    # ragged final block handled by Pallas, no pad

    b1_col = b1.reshape(n_hid, 1)
    b2_col = b2.reshape(n_out, 1)

    bytes_f32 = 4
    cost = pl.CostEstimate(
        flops=2 * B * (n_in * n_hid + n_hid * n_out),
        transcendentals=B * n_hid,                       # sigmoid -> exp
        bytes_accessed=(x.size + w1.size + b1.size + w2.size + b2.size) * bytes_f32
                       + B * 4,                          # int32 output
    )

    out = pl.pallas_call(
        _net_kernel,
        out_shape=jax.ShapeDtypeStruct((1, B), jnp.int32),
        grid=grid,
        in_specs=[
            pl.BlockSpec((tm, n_in), lambda i: (i, 0)),      # x tile, streamed
            pl.BlockSpec((n_hid, n_in), lambda i: (0, 0)),   # W1 resident
            pl.BlockSpec((n_hid, 1), lambda i: (0, 0)),      # b1 resident
            pl.BlockSpec((n_out, n_hid), lambda i: (0, 0)),  # W2 resident
            pl.BlockSpec((n_out, 1), lambda i: (0, 0)),      # b2 resident
        ],
        out_specs=pl.BlockSpec((1, tm), lambda i: (0, i)),
        compiler_params=pltpu.CompilerParams(
            dimension_semantics=("parallel",)),              # megacore-friendly (v7x)
        cost_estimate=cost,
    )(x, w1, b1_col, w2, b2_col)

    return out[0]                                            # (B,) int32


if __name__ == "__main__":
    # Small shapes consistent with the module: batch=8, n_inputs=32,
    # n_hidden=32, n_outputs=8.
    B, N_IN, N_HID, N_OUT = 8, 32, 32, 8

    key = jax.random.PRNGKey(0)
    kx, k1, kb1, k2, kb2 = jax.random.split(key, 5)

    x = jax.random.normal(kx, (B, N_IN), dtype=jnp.float32)

    # Parameters in PyTorch nn.Linear layout: weight (out, in), bias (out,).
    w1 = jax.random.normal(k1, (N_HID, N_IN), dtype=jnp.float32) * 0.1
    b1 = jax.random.normal(kb1, (N_HID,), dtype=jnp.float32) * 0.1
    w2 = jax.random.normal(k2, (N_OUT, N_HID), dtype=jnp.float32) * 0.1
    b2 = jax.random.normal(kb2, (N_OUT,), dtype=jnp.float32) * 0.1

    y = net_forward(x, w1, b1, w2, b2)
    jax.block_until_ready(y)

    # Pure-JAX reference (full module semantics, including the softmax).
    h_ref = jax.nn.sigmoid(x @ w1.T + b1)
    logits_ref = h_ref @ w2.T + b2
    y_ref = jnp.argmax(jax.nn.softmax(logits_ref, axis=1), axis=1).astype(jnp.int32)
    assert jnp.array_equal(y, y_ref), (y, y_ref)

    print("KERNEL_OK")
</pallas_src>

<mosaic_0001>
module attributes {stable_mosaic.version = 11 : i64} {
  func.func @_net_kernel(%arg0: i32, %arg1: memref<8x32xf32, #tpu.memory_space<vmem>>, %arg2: memref<32x32xf32, #tpu.memory_space<vmem>>, %arg3: memref<32x1xf32, #tpu.memory_space<vmem>>, %arg4: memref<8x32xf32, #tpu.memory_space<vmem>>, %arg5: memref<8x1xf32, #tpu.memory_space<vmem>>, %arg6: memref<1x8xi32, #tpu.memory_space<vmem>>) attributes {dimension_semantics = [#tpu.dimension_semantics<parallel>], iteration_bounds = array<i64: 1>, scalar_prefetch = 0 : i64, scratch_operands = 0 : i64, tpu.core_type = #tpu.core_type<tc>, window_params = [{transform_indices = @transform_0, window_bounds = array<i64: 8, 32>}, {pipeline_mode = #tpu.pipeline_mode<synchronous>, transform_indices = @transform_1, window_bounds = array<i64: 32, 32>}, {pipeline_mode = #tpu.pipeline_mode<synchronous>, transform_indices = @transform_2, window_bounds = array<i64: 32, 1>}, {pipeline_mode = #tpu.pipeline_mode<synchronous>, transform_indices = @transform_3, window_bounds = array<i64: 8, 32>}, {pipeline_mode = #tpu.pipeline_mode<synchronous>, transform_indices = @transform_4, window_bounds = array<i64: 8, 1>}, {transform_indices = @transform_5, window_bounds = array<i64: 1, 8>}]} {
    %c0 = arith.constant 0 : index
    %c0_0 = arith.constant 0 : index
    %0 = vector.load %arg2[%c0, %c0_0] : memref<32x32xf32, #tpu.memory_space<vmem>>, vector<32x32xf32>
    %c0_1 = arith.constant 0 : index
    %c0_2 = arith.constant 0 : index
    %1 = vector.load %arg1[%c0_1, %c0_2] : memref<8x32xf32, #tpu.memory_space<vmem>>, vector<8x32xf32>
    %cst = arith.constant dense<0.000000e+00> : vector<32x8xf32>
    %2 = tpu.matmul %0, %1, %cst {dimension_numbers = #tpu.dot_dimension_numbers<[1], [1], [0], [0], [0, 0, 1, 0], [], []>} : vector<32x32xf32>, vector<8x32xf32>, vector<32x8xf32> -> vector<32x8xf32>
    %c0_3 = arith.constant 0 : index
    %c0_4 = arith.constant 0 : index
    %3 = vector.load %arg3[%c0_3, %c0_4] : memref<32x1xf32, #tpu.memory_space<vmem>>, vector<32x1xf32>
    %4 = vector.broadcast %3 : vector<32x1xf32> to vector<32x8xf32>
    %5 = arith.addf %2, %4 : vector<32x8xf32>
    %6 = arith.negf %5 : vector<32x8xf32>
    %7 = math.exp %6 : vector<32x8xf32>
    %cst_5 = arith.constant 1.000000e+00 : f32
    %8 = vector.broadcast %cst_5 : f32 to vector<32x8xf32>
    %9 = arith.addf %8, %7 : vector<32x8xf32>
    %10 = arith.divf %8, %9 : vector<32x8xf32>
    %c0_6 = arith.constant 0 : index
    %c0_7 = arith.constant 0 : index
    %11 = vector.load %arg4[%c0_6, %c0_7] : memref<8x32xf32, #tpu.memory_space<vmem>>, vector<8x32xf32>
    %cst_8 = arith.constant dense<0.000000e+00> : vector<8x8xf32>
    %12 = tpu.matmul %11, %10, %cst_8 {dimension_numbers = #tpu.dot_dimension_numbers<[1], [0], [0], [1], [0, 0, 1, 1], [], []>} : vector<8x32xf32>, vector<32x8xf32>, vector<8x8xf32> -> vector<8x8xf32>
    %c0_9 = arith.constant 0 : index
    %c0_10 = arith.constant 0 : index
    %13 = vector.load %arg5[%c0_9, %c0_10] : memref<8x1xf32, #tpu.memory_space<vmem>>, vector<8x1xf32>
    %14 = vector.broadcast %13 : vector<8x1xf32> to vector<8x8xf32>
    %15 = arith.addf %12, %14 : vector<8x8xf32>
    %16 = tpu.iota {dimensions = array<i32: 0>} : vector<8x8xi32>
    %cst_11 = arith.constant dense<0xFF800000> : vector<8xf32>
    %17 = vector.multi_reduction <maximumf>, %15, %cst_11 [0] : vector<8x8xf32> to vector<8xf32>
    %18 = vector.shape_cast %17 : vector<8xf32> to vector<1x8xf32>
    %19 = vector.broadcast %18 : vector<1x8xf32> to vector<8x8xf32>
    %20 = arith.cmpf oeq, %15, %19 : vector<8x8xf32>
    %c8_i32 = arith.constant 8 : i32
    %21 = vector.broadcast %c8_i32 : i32 to vector<8x8xi32>
    %22 = arith.select %20, %16, %21 : vector<8x8xi1>, vector<8x8xi32>
    %cst_12 = arith.constant dense<2147483647> : vector<8xi32>
    %23 = vector.multi_reduction <minsi>, %22, %cst_12 [0] : vector<8x8xi32> to vector<8xi32>
    %24 = vector.shape_cast %23 : vector<8xi32> to vector<1x8xi32>
    %c0_13 = arith.constant 0 : index
    %c0_14 = arith.constant 0 : index
    %25 = vector.load %arg6[%c0_13, %c0_14] : memref<1x8xi32, #tpu.memory_space<vmem>>, vector<1x8xi32>
    tpu.vector_store %arg6[%c0_13, %c0_14], %24 {strides = array<i32>} : memref<1x8xi32, #tpu.memory_space<vmem>>, vector<1x8xi32>,
    return
  }
  func.func @transform_0(%arg0: i32) -> (i32, i32) {
    %c0_i32 = arith.constant 0 : i32
    %c0_i32_0 = arith.constant 0 : i32
    return %arg0, %c0_i32 : i32, i32
  }
  func.func @transform_1(%arg0: i32) -> (i32, i32) {
    %c0_i32 = arith.constant 0 : i32
    %c0_i32_0 = arith.constant 0 : i32
    %c0_i32_1 = arith.constant 0 : i32
    return %c0_i32, %c0_i32_0 : i32, i32
  }
  func.func @transform_2(%arg0: i32) -> (i32, i32) {
    %c0_i32 = arith.constant 0 : i32
    %c0_i32_0 = arith.constant 0 : i32
    %c0_i32_1 = arith.constant 0 : i32
    return %c0_i32, %c0_i32_0 : i32, i32
  }
  func.func @transform_3(%arg0: i32) -> (i32, i32) {
    %c0_i32 = arith.constant 0 : i32
    %c0_i32_0 = arith.constant 0 : i32
    %c0_i32_1 = arith.constant 0 : i32
    return %c0_i32, %c0_i32_0 : i32, i32
  }
  func.func @transform_4(%arg0: i32) -> (i32, i32) {
    %c0_i32 = arith.constant 0 : i32
    %c0_i32_0 = arith.constant 0 : i32
    %c0_i32_1 = arith.constant 0 : i32
    return %c0_i32, %c0_i32_0 : i32, i32
  }
  func.func @transform_5(%arg0: i32) -> (i32, i32) {
    %c0_i32 = arith.constant 0 : i32
    %c0_i32_0 = arith.constant 0 : i32
    return %c0_i32, %arg0 : i32, i32
  }
}

</mosaic_0001>

<bundles_post_ra>
// kernel: net_forward.1
= control target key start
LH: loop header
LB: loop body
LE: loop exit
PB: predicated region body
PF: predicated region fallthrough
CT: control target
= control target key end

     0   :  { %vm50_vm0 = vcmask 261120   ;;  %v385_v4 = vmov 0   ;;  %s472_s0 = inlined_call_operand.vmem [shape: f32[8,32], index: 0, kind: input, shape index: {}]   ;;  %s473_s1 = inlined_call_operand.vmem [shape: f32[32,32], index: 1, kind: input, shape index: {}]   ;;  %s474_s2 = inlined_call_operand.vmem [shape: f32[32,1], index: 2, kind: input, shape index: {}]   ;;  %s475_s3 = inlined_call_operand.vmem [shape: f32[8,32], index: 3, kind: input, shape index: {}]   ;;  %s476_s4 = inlined_call_operand.vmem [shape: f32[8,1], index: 4, kind: input, shape index: {}]   ;;  %s477_s5 = inlined_call_operand.hbm [shape: s32[1,8], index: 5, kind: output, shape index: {}]  }
   0x1   :  { %v25_v0 = vld [vmem:[%s472_s0] sm:$0xff]  ;;  %v22_v3 = vld [vmem:[%s473_s1 + $0x8] sm:$0xff]  ;;  %343 = vset.pattern.permute.xlu0 %v385_v4  ;;  %v28_v5 = vld [vmem:[%s474_s2 + $0x10] sm:$0xff]  ;;  %344 = vset.pattern.permute.xlu1 %v385_v4 }
   0x2   :  { %v21_v1 = vld [vmem:[%s473_s1] sm:$0xff]  ;;  %313 = vmatprep.subr.msk.mxu0 %vm50_vm0, %v25_v0  ;;  %v23_v6 = vld [vmem:[%s473_s1 + $0x10] sm:$0xff] }
   0x3   :  { %315 = vmatprep.mubr.msk.f32.mxu0 %vm50_vm0, %v21_v1  ;;  %v26_v2 = vld [vmem:[%s474_s2] sm:$0xff]  ;;  %314 = vmatpush3.xpose.msk.msra.mxu0 %vm50_vm0, %v25_v0 }
   0x4   :  { %32 = vperm.xlu0 %343, %v26_v2  }
   0x5   :  { %10 = vsyncpa [#allocation3], 0  ;;  %v27_v7 = vld [vmem:[%s474_s2 + $0x8] sm:$0xff]  ;;  %42 = vperm.xlu1 %344, %v28_v5   ;;  %v29_v8 = vld [vmem:[%s474_s2 + $0x18] sm:$0xff]  ;;  %v386_v11 = vmov 0.0|0.0   ;;  %vm387_vm1 = vmmov 0   ;;  %v255_v52 = vlaneseq }
   0x6   :  { %316 = vmatmul.mubr.msk.f32.vlgmr.msra.gmra.mrb[0].mxu0 %vm50_vm0, %v22_v3  ;;  %v24_v9 = vld [vmem:[%s473_s1 + $0x18] sm:$0xff]  ;;  %v176_v10 = vld [vmem:[%s476_s4] sm:$0xff]  ;;  %332 = vmatprep.subr.bf16.mxu1 %v386_v11  ;;  %v388_v12 = vmov 0.0   ;;  %vm257_vm2 = vcmask 64512   ;;  %vm277_vm6 = vcmask 57344  }
   0x7   :  { %318 = vmatprep.mubr.msk.f32.mxu0 %vm50_vm0, %v23_v6  ;;  %329 = vmatprep.mubr.msk.f32.mxu1 %vm387_vm1, %v388_v12  ;;  %v175_v43 = vld [vmem:[%s475_s3] sm:$0xff]  ;;  %v256_v55 = vshrl.u32 %v255_v52, 7  ;;  %s389_s3 = smov [#allocation2]  }
   0x8   :  { %37 = vperm.xlu0 %343, %v27_v7   ;;  %s285_s4 = sshll.u32 %s389_s3, 4  ;;  %s286_s4 = int_to_ptr.vmem [resolvable:$true] %s285_s4 }
   0x9   :  { %47 = vperm.xlu1 %344, %v29_v8   ;;  %s361_s12 = scalar_lea.vmem %s286_s4, 16  ;;  %s365_s13 = scalar_lea.vmem %s286_s4, 32 }
   0xa   :  { %319 = vmatmul.mubr.msk.f32.gmra.mrb[2].mxu0 %vm50_vm0, %v24_v9  ;;  %p362_p0 = scmp.ne.s32.totalorder %s286_s4, %s361_s12  ;;  %p366_p1 = scmp.lt.s32.totalorder %s286_s4, %s286_s4 }
   0xb   :  { %p367_p2 = scmp.lt.s32.totalorder %s365_s13, %s361_s12 }
   0xc   :  { %179 = vperm.xlu0 %343, %v176_v10  }
   0xd   :  { %p368_p3 = por %p367_p2, %p366_p1 }
   0xf   :  { %p369_p4 = pnand %p368_p3, %p362_p0 }
  0x83   :  { %v33_v13 = vpop.permute.xlu0 %32 }
  0x84   :  { %v43_v14 = vpop.permute.xlu1 %42 }
  0x87   :  { %v38_v15 = vpop.permute.xlu0 %37 }
  0x88   :  { %v48_v21 = vpop.permute.xlu1 %47 }
  0x8b   :  { %v180_v44 = vpop.permute.xlu0 %179 }
  0xd9   :  { %v317_v16 = vpop.f32.mrb[0].mxu0 }
  0xda   :  { %v138_v17 = vadd.f32 %v317_v16, %v38_v15  ;;  %v132_v18 = vpop.f32.mrb[1].mxu0 }
  0xdb   :  { %v133_v19 = vadd.f32 %v132_v18, %v33_v13 }
  0xdc   :  { %v299_v20 = vmul.f32 -1.442695, %v138_v17 }
  0xdd   :  { %v298_v22 = vmul.f32 -1.442695, %v133_v19  ;;  %v320_v23 = vpop.f32.mrb[2].mxu0 }
  0xde   :  { %345 = vpow2.f32 %v299_v20  ;;  %v148_v24 = vadd.f32 %v320_v23, %v48_v21  ;;  %v142_v25 = vpop.f32.mrb[3].mxu0 }
  0xdf   :  { %347 = vpow2.f32 %v298_v22  ;;  %v143_v26 = vadd.f32 %v142_v25, %v43_v14 }
  0xe0   :  { %v301_v27 = vmul.f32 -1.442695, %v148_v24 }
  0xe1   :  { %v300_v28 = vmul.f32 -1.442695, %v143_v26 }
  0xe2   :  { %349 = vpow2.f32 %v301_v27 }
  0xe3   :  { %351 = vpow2.f32 %v300_v28 }
  0xe8   :  { %v346_v29 = vpop.eup %345 }
  0xe9   :  { %v348_v30 = vpop.eup %347  ;;  %v164_v31 = vadd.f32 1.0, %v346_v29 }
  0xea   :  { %v163_v32 = vadd.f32 1.0, %v348_v30 }
  0xeb   :  { %353 = vrcp.f32 %v164_v31 }
  0xec   :  { %v350_v33 = vpop.eup %349  ;;  %355 = vrcp.f32 %v163_v32 }
  0xed   :  { %v352_v34 = vpop.eup %351  ;;  %v166_v35 = vadd.f32 1.0, %v350_v33 }
  0xee   :  { %v165_v36 = vadd.f32 1.0, %v352_v34 }
  0xef   :  { %357 = vrcp.f32 %v166_v35 }
  0xf0   :  { %359 = vrcp.f32 %v165_v36 }
  0xf5   :  { %v354_v37 = vpop.eup %353 }
  0xf6   :  { %v356_v38 = vpop.eup %355 }
  0xf7   :  { %v333_v39 = vpack.c.bf16 %v354_v37, %v356_v38 }
  0xf9   :  { %v358_v40 = vpop.eup %357  ;;  %334 = vmatpush3.bf16.msra.mxu1 %v333_v39 }
  0xfa   :  { %v360_v41 = vpop.eup %359  ;;  %335 = vmatprep.subr.bf16.mxu1 %v386_v11 }
  0xfb   :  { %v336_v42 = vpack.c.bf16 %v358_v40, %v360_v41 }
  0xfd   :  { %337 = vmatpush3.bf16.msra.mxu1 %v336_v42 }
 0x100   :  { %330 = vmatmul.mubr.msk.f32.vlgmr.msra.gmra.mrb[0].mxu1 %vm50_vm0, %v175_v43 }
 0x1d3   :  { %v251_v45 = vpop.f32.mrb[0].mxu1 }
 0x1d4   :  { %v252_v46 = vadd.f32 %v251_v45, %v180_v44  ;;  %v331_v47 = vpop.f32.mrb[1].mxu1 }
 0x1d6   :  { %v258_v48 = vsel %vm257_vm2, %v252_v46, -inf }
 0x1d7   :  { %v259_v49 = vrot.slane %v258_v48, 4 }
 0x1d9   :  { %v260_v50 = vmax.f32 %v258_v48, %v259_v49 }
 0x1db   :  { %v261_v51 = vrot.slane %v260_v50, 2 }
 0x1dd   :  { %v262_v53 = vmax.f32 %v260_v50, %v261_v51 }
 0x1df   :  { %v263_v54 = vrot.slane %v262_v53, 1 }
 0x1e1   :  { %v264_v56 = vmax.f32 %v262_v53, %v263_v54 }
 0x1e3   :  { %vm265_vm3 = vcmp.eq.f32.partialorder %v252_v46, %v264_v56 }
 0x1e4   :  { %v266_v57 = vsel %vm265_vm3, %v256_v55, 8 }
 0x1e5   :  { %v267_v58 = vsel %vm257_vm2, %v266_v57, 2147483647 }
 0x1e6   :  { %v268_v59 = vrot.slane %v267_v58, 4 }
 0x1e8   :  { %vm269_vm4 = vcmp.lt.s32.totalorder %v267_v58, %v268_v59 }
 0x1e9   :  { %v270_v60 = vsel %vm269_vm4, %v267_v58, %v268_v59 }
 0x1ea   :  { %v271_v61 = vrot.slane %v270_v60, 2 }
 0x1ec   :  { %vm272_vm5 = vcmp.lt.s32.totalorder %v270_v60, %v271_v61 }
 0x1ed   :  { %v273_v62 = vsel %vm272_vm5, %v270_v60, %v271_v61 }
 0x1ee   :  { %v274_v63 = vrot.slane %v273_v62, 1 }
 0x1f0   :  { %vm275_vm7 = vcmp.lt.s32.totalorder %v273_v62, %v274_v63 }
 0x1f1   :  { %v276_v0 = vsel %vm275_vm7, %v273_v62, %v274_v63 }
 0x1f2   :  { %278 = vst.msk [vmem:[#allocation2] sm:$0x1] %vm277_vm6, %v276_v0 }
 0x1f3   :  { %372 = shalt.err (!%p369_p4)
}
 0x1f4   :  { %s373_s16 = scalar_lea.hbm %s477_s5, 16 }
 0x1f5   :  { %p374_p5 = scmp.ne.s32.totalorder %s477_s5, %s373_s16  ;;  %p377_p6 = scmp.lt.u32.totalorder %s373_s16, %s477_s5 }
 0x1f7   :  { %p379_p7 = pnand %p377_p6, %p374_p5 }
 0x1f9   :  { %382 = shalt.err (!%p379_p7)
}
 0x1fa   :  { %288 = dma.vmem_to_hbm [thread:$0]  %s286_s4, 16, %s477_s5, [#allocation3]  }
 0x1fb   :  { %383 = dma.done.wait [#allocation3], 16  }
 0x1fc   :  { %384 = vsyncadd [#allocation3], 4294967280 }
 0x1fd   :  { %292 = vsyncpa [#allocation3], 1 }

</bundles_post_ra>
